<compile_context>
chip_gen: v6e
topology: v6e:2x2x1
jax: 0.10.0
libtpu: 0.0.40
codegen_flags: <defaults>
</compile_context>

<pallas_src>
import jax
import jax.numpy as jnp
from jax.experimental import pallas as pl
from jax.experimental.pallas import tpu as pltpu


# ---------------------------------------------------------------------------
# Pallas kernel: out[r, :] = x[r, :] * gate[r]
# gate block is (tr, 1) f32 (sublane layout), x block is (tr, tl) lane-dense.
# ---------------------------------------------------------------------------
def _gated_mul_kernel(g_ref, x_ref, o_ref):
    o_ref[...] = (x_ref[...] * g_ref[...]).astype(o_ref.dtype)


def _largest_divisor_tile(dim, unit, cap):
    """Largest multiple of `unit` that divides `dim` and is <= cap (>= unit).
    `dim` must be a positive multiple of `unit`."""
    t = min(cap, dim)
    t = max(unit, (t // unit) * unit)
    while dim % t != 0:
        t -= unit
    return t


def _device_budgets():
    """Returns (per-buffer block budget in bytes, vmem_limit_bytes or None)."""
    try:
        kind = jax.devices()[0].device_kind.lower()
    except Exception:
        kind = ""
    if "v7" in kind:
        return 8 << 20, 48 << 20          # 64 MiB physical VMEM per TC
    if "v6" in kind:
        return 8 << 20, 64 << 20          # 128 MiB physical
    if "v5e" in kind or "v5 lite" in kind:
        return 3 << 20, None              # stay inside 16 MiB scoped default
    if "v5" in kind:                      # v5p
        return 8 << 20, 64 << 20
    return 2 << 20, None                  # unknown chip: conservative default


def se_layer(x, x_se, w_reduce, b_reduce, w_expand, b_expand):
    """x: (B, C, H, W), x_se: (B, C, 1, 1). Returns x * sigmoid(MLP(x_se))."""
    B, C, H, W = x.shape
    rows, HW = B * C, H * W

    # ---- gate MLP (tiny, always f32, plain jnp — fused by XLA) -------------
    s = x_se.reshape(B, C).astype(jnp.float32)
    wr = jnp.asarray(w_reduce, jnp.float32)
    we = jnp.asarray(w_expand, jnp.float32)
    br = jnp.asarray(b_reduce, jnp.float32)
    be = jnp.asarray(b_expand, jnp.float32)
    h = jnp.maximum(s @ wr.T + br, 0.0)
    gate = jax.nn.sigmoid(h @ we.T + be)                   # (B, C) f32

    # ---- gated multiply: lane-dense 2D (rows, lanes) Pallas sweep ----------
    x_flat = x.reshape(rows, HW)
    gate_col = gate.reshape(rows, 1)                       # keep f32

    rows_p = -(-rows // 8) * 8
    HW_p = -(-HW // 128) * 128
    padded = (rows_p != rows) or (HW_p != HW)
    if padded:
        x_flat = jnp.pad(x_flat, ((0, rows_p - rows), (0, HW_p - HW)))
        gate_col = jnp.pad(gate_col, ((0, rows_p - rows), (0, 0)))

    budget, vmem_limit = _device_budgets()
    itemsize = jnp.dtype(x.dtype).itemsize

    # Lane tile first: prefer the full (contiguous) row if an 8-row strip fits.
    max_lanes = max(128, (budget // (8 * itemsize)) // 128 * 128)
    tl = HW_p if HW_p <= max_lanes else _largest_divisor_tile(HW_p, 128, max_lanes)
    # Row tile: fill the per-buffer budget.
    max_rows = max(8, (budget // (tl * itemsize)) // 8 * 8)
    tr = _largest_divisor_tile(rows_p, 8, max_rows)
    # Keep >= 2 grid programs along a parallel axis so both v7x cores get work.
    if (rows_p // tr) * (HW_p // tl) < 2 and rows_p >= 16:
        tr = _largest_divisor_tile(rows_p, 8, rows_p // 2)

    grid = (rows_p // tr, HW_p // tl)

    cp_kwargs = dict(dimension_semantics=("parallel", "parallel"))
    if vmem_limit is not None:
        cp_kwargs["vmem_limit_bytes"] = vmem_limit

    out_flat = pl.pallas_call(
        _gated_mul_kernel,
        out_shape=jax.ShapeDtypeStruct((rows_p, HW_p), x.dtype),
        grid=grid,
        in_specs=[
            pl.BlockSpec((tr, 1), lambda i, j: (i, 0)),    # gate rows (sublane)
            pl.BlockSpec((tr, tl), lambda i, j: (i, j)),   # x tile (lane-dense)
        ],
        out_specs=pl.BlockSpec((tr, tl), lambda i, j: (i, j)),
        compiler_params=pltpu.CompilerParams(**cp_kwargs),
    )(gate_col, x_flat)

    if padded:
        out_flat = out_flat[:rows, :HW]
    return out_flat.reshape(B, C, H, W)


def _reference(x, x_se, w_reduce, b_reduce, w_expand, b_expand):
    B, C, H, W = x.shape
    s = x_se.reshape(B, C).astype(jnp.float32)
    h = jnp.maximum(s @ w_reduce.T + b_reduce, 0.0)
    g = jax.nn.sigmoid(h @ w_expand.T + b_expand)
    out = x.astype(jnp.float32) * g[:, :, None, None]
    return out.astype(x.dtype)


if __name__ == "__main__":
    key = jax.random.PRNGKey(0)

    def make_inputs(B, C, H, W, dtype):
        ks = jax.random.split(jax.random.fold_in(key, B * 1009 + C * 101 + H), 6)
        x = jax.random.normal(ks[0], (B, C, H, W), dtype=jnp.float32).astype(dtype)
        x_se = jax.random.normal(ks[1], (B, C, 1, 1), dtype=jnp.float32)
        # Conv2d(C, C, 1, bias=True) weights: (C, C, 1, 1) stored as (C, C).
        w_r = jax.random.normal(ks[2], (C, C), dtype=jnp.float32) * 0.1
        b_r = jax.random.normal(ks[3], (C,), dtype=jnp.float32) * 0.1
        w_e = jax.random.normal(ks[4], (C, C), dtype=jnp.float32) * 0.1
        b_e = jax.random.normal(ks[5], (C,), dtype=jnp.float32) * 0.1
        return x, x_se, w_r, b_r, w_e, b_e

    configs = [
        ((2, 4, 16, 16), jnp.float32, 1e-5),   # aligned: rows=8, HW=256
        ((2, 4, 7, 7), jnp.float32, 1e-5),     # HW=49 -> lane padding path
        ((3, 5, 16, 16), jnp.float32, 1e-5),   # rows=15 -> sublane padding path
        ((2, 4, 16, 16), jnp.bfloat16, 2e-2),  # bf16 streaming (gate stays f32)
    ]
    for (B, C, H, W), dtype, tol in configs:
        args = make_inputs(B, C, H, W, dtype)
        out = jax.block_until_ready(se_layer(*args))
        ref = _reference(*args)
        assert out.shape == (B, C, H, W) and out.dtype == dtype
        assert jnp.allclose(out.astype(jnp.float32), ref.astype(jnp.float32),
                            atol=tol, rtol=tol), f"mismatch at {(B, C, H, W)} {dtype}"

    # TODO(synk): the remaining DepthInitialModule stages (3x3 reduce_conv,
    # BasicBlocks, ASPP dilated convs, DCN deformable conv, BatchNorm, softmax)
    # are outside the scope of this SELayer kernel.
    print("KERNEL_OK")
</pallas_src>

<mosaic_0001>
module attributes {stable_mosaic.version = 11 : i64} {
  func.func @_gated_mul_kernel(%arg0: i32, %arg1: i32, %arg2: memref<8x1xf32, #tpu.memory_space<vmem>>, %arg3: memref<8x256xf32, #tpu.memory_space<vmem>>, %arg4: memref<8x256xf32, #tpu.memory_space<vmem>>) attributes {dimension_semantics = [#tpu.dimension_semantics<parallel>, #tpu.dimension_semantics<parallel>], iteration_bounds = array<i64: 1, 1>, scalar_prefetch = 0 : i64, scratch_operands = 0 : i64, tpu.core_type = #tpu.core_type<tc>, window_params = [{transform_indices = @transform_0, window_bounds = array<i64: 8, 1>}, {transform_indices = @transform_1, window_bounds = array<i64: 8, 256>}, {transform_indices = @transform_2, window_bounds = array<i64: 8, 256>}]} {
    %c0 = arith.constant 0 : index
    %c0_0 = arith.constant 0 : index
    %0 = vector.load %arg3[%c0, %c0_0] : memref<8x256xf32, #tpu.memory_space<vmem>>, vector<8x256xf32>
    %c0_1 = arith.constant 0 : index
    %c0_2 = arith.constant 0 : index
    %1 = vector.load %arg2[%c0_1, %c0_2] : memref<8x1xf32, #tpu.memory_space<vmem>>, vector<8x1xf32>
    %2 = vector.broadcast %1 : vector<8x1xf32> to vector<8x256xf32>
    %3 = arith.mulf %0, %2 : vector<8x256xf32>
    %c0_3 = arith.constant 0 : index
    %c0_4 = arith.constant 0 : index
    %4 = vector.load %arg4[%c0_3, %c0_4] : memref<8x256xf32, #tpu.memory_space<vmem>>, vector<8x256xf32>
    tpu.vector_store %arg4[%c0_3, %c0_4], %3 {strides = array<i32>} : memref<8x256xf32, #tpu.memory_space<vmem>>, vector<8x256xf32>,
    return
  }
  func.func @transform_0(%arg0: i32, %arg1: i32) -> (i32, i32) {
    %c0_i32 = arith.constant 0 : i32
    %c0_i32_0 = arith.constant 0 : i32
    return %arg0, %c0_i32 : i32, i32
  }
  func.func @transform_1(%arg0: i32, %arg1: i32) -> (i32, i32) {
    %c0_i32 = arith.constant 0 : i32
    return %arg0, %arg1 : i32, i32
  }
  func.func @transform_2(%arg0: i32, %arg1: i32) -> (i32, i32) {
    %c0_i32 = arith.constant 0 : i32
    return %arg0, %arg1 : i32, i32
  }
}

</mosaic_0001>

<bundles_post_ra>
// kernel: tpu_custom_call.1
= control target key start
LH: loop header
LB: loop body
LE: loop exit
PB: predicated region body
PF: predicated region fallthrough
CT: control target
= control target key end

     0   :  { %7 = vsyncpa [#allocation3], 0  ;;  %s126_s0 = inlined_call_operand.vmem [shape: f32[8,1], index: 0, kind: input, shape index: {}]   ;;  %s127_s1 = inlined_call_operand.hbm [shape: f32[8,256], index: 1, kind: input, shape index: {}]   ;;  %s128_s2 = inlined_call_operand.hbm [shape: f32[8,256], index: 2, kind: output, shape index: {}]  }
   0x1   :  { %8 = vsyncpa [#allocation4], 0  ;;  %s99_s9 = smov [#allocation2]  }
   0x2   :  { %s17_s10 = sshll.u32 %s99_s9, 4  ;;  %s18_s10 = int_to_ptr.vmem [resolvable:$true] %s17_s10 }
   0x3   :  { %s63_s11 = scalar_lea.vmem %s18_s10, 256  ;;  %p68_p1 = scmp.lt.s32.totalorder %s18_s10, %s18_s10 }
   0x4   :  { %p64_p0 = scmp.ne.s32.totalorder %s18_s10, %s63_s11  ;;  %p69_p2 = scmp.lt.s32.totalorder %s63_s11, %s63_s11 }
   0x6   :  { %p70_p3 = por %p69_p2, %p68_p1 }
   0x8   :  { %p71_p4 = pnand %p70_p3, %p64_p0 }
   0xa   :  { %74 = shalt.err (!%p71_p4)
}
   0xb   :  { %20 = dma.hbm_to_vmem [thread:$0]  %s127_s1, 256, %s18_s10, [#allocation3]  }
   0xc   :  { %95 = dma.done.wait [#allocation3], 256  }
   0xd   :  { %96 = vsyncadd [#allocation3], 4294967040  ;;  %v100_v0 = vmov 0   ;;  %v26_v1 = vld [vmem:[%s126_s0] sm:$0xff]  ;;  %v25_v3 = vld [vmem:[#allocation2 + $0x8] sm:$0xff]  ;;  %s101_s16 = smov [#allocation5]  }
   0xe   :  { %54 = vset.pattern.permute.xlu0 %v100_v0  ;;  %v24_v2 = vld [vmem:[#allocation2] sm:$0xff]  ;;  %s42_s17 = sshll.u32 %s101_s16, 4  ;;  %s43_s17 = int_to_ptr.vmem [resolvable:$true] %s42_s17 }
   0xf   :  { %29 = vperm.xlu0 %54, %v26_v1   ;;  %s75_s1 = scalar_lea.vmem %s43_s17, 256  ;;  %p80_p6 = scmp.lt.s32.totalorder %s43_s17, %s43_s17 }
  0x10   :  { %p76_p5 = scmp.ne.s32.totalorder %s43_s17, %s75_s1  ;;  %p81_p7 = scmp.lt.s32.totalorder %s75_s1, %s75_s1 }
  0x12   :  { %p82_p8 = por %p81_p7, %p80_p6 }
  0x14   :  { %p83_p9 = pnand %p82_p8, %p76_p5 }
  0x8a   :  { %v30_v4 = vpop.permute.xlu0 %29 }
  0x8b   :  { %v32_v5 = vmul.f32 %v30_v4, %v24_v2  ;;  %v33_v6 = vmul.f32 %v30_v4, %v25_v3 }
  0x8d   :  { %34 = vst [vmem:[#allocation5] sm:$0xff] %v32_v5  ;;  %35 = vst [vmem:[#allocation5 + $0x8] sm:$0xff] %v33_v6 }
  0x8e   :  { %86 = shalt.err (!%p83_p9)
}
  0x8f   :  { %45 = dma.vmem_to_hbm [thread:$0]  %s43_s17, 256, %s128_s2, [#allocation4]  }
  0x90   :  { %97 = dma.done.wait [#allocation4], 256  }
  0x91   :  { %98 = vsyncadd [#allocation4], 4294967040 }
  0x92   :  { %49 = vsyncpa [#allocation3], 1 }
  0x93   :  { %50 = vsyncpa [#allocation4], 1 }

</bundles_post_ra>
